<compile_context>
chip_gen: v6e
topology: v6e:2x2x1
jax: 0.10.0
libtpu: 0.0.40
codegen_flags: <defaults>
</compile_context>

<pallas_src>
import jax
import jax.numpy as jnp
from jax import lax
from jax.experimental import pallas as pl
from jax.experimental.pallas import tpu as pltpu


def _round_up(x, m):
    return (x + m - 1) // m * m


def encoder_gru_kernel(x_ref,      # (T, H)    embedded tokens (gathered in wrapper)
                       h0_ref,     # (1, Hp)   initial hidden state, lane-padded
                       wih_ref,    # (H, 3Hp)  fused input->gate weights, gate order (r, z, n)
                       whh_ref,    # (Hp, 3Hp) fused hidden->gate weights
                       bih_ref,    # (1, 3Hp)  fused input biases
                       bhh_ref,    # (1, 3Hp)  fused hidden biases
                       out_ref,    # (T, Hp)   all hidden states, resident in VMEM
                       gi_scr):    # (T, 3Hp)  VMEM scratch: hoisted input projections
    T, Hp = out_ref.shape

    # Hoisted input projection: one M=T MXU matmul instead of T serial M=1 matmuls.
    gi_scr[...] = (
        jnp.dot(x_ref[...], wih_ref[...], preferred_element_type=jnp.float32)
        + bih_ref[...]
    )

    def step(t, h):
        # Only the hidden-path matmul remains on the serial critical path.
        gh = (jnp.dot(h, whh_ref[...], preferred_element_type=jnp.float32)
              + bhh_ref[...])
        gi = gi_scr[pl.ds(t, 1), :]
        # Gate slices are 128-lane (vreg-boundary) aligned because each gate owns Hp lanes.
        r = jax.nn.sigmoid(gi[:, 0:Hp] + gh[:, 0:Hp])                        # reset gate
        z = jax.nn.sigmoid(gi[:, Hp:2 * Hp] + gh[:, Hp:2 * Hp])              # update gate
        n = jnp.tanh(gi[:, 2 * Hp:3 * Hp] + r * gh[:, 2 * Hp:3 * Hp])        # new gate
        h_new = (1.0 - z) * n + z * h                                        # torch.nn.GRU update
        out_ref[pl.ds(t, 1), :] = h_new       # lane-dense VMEM store; single HBM writeback at end
        return h_new

    lax.fori_loop(0, T, step, h0_ref[...], unroll=True)


def encoder_run(tokens, hidden, params):
    """Run the Encoder GRU over a token sequence inside ONE pallas_call grid step.

    tokens: int (T,); hidden: float32 (1, 1, H).
    Returns (outputs (T, 1, H), final_hidden (1, 1, H)) -- identical to looping the
    PyTorch Encoder.forward over the tokens."""
    emb = params["embedding"]          # (V, H)
    wih = params["w_ih"]               # (H, 3Hp) fused + lane-padded
    whh = params["w_hh"]               # (Hp, 3Hp)
    bih = params["b_ih"]               # (1, 3Hp)
    bhh = params["b_hh"]               # (1, 3Hp)
    V, H = emb.shape
    Hp = _round_up(H, 128)
    T = int(tokens.shape[0])

    # Embedding lookup hoisted to the wrapper (XLA gather on clipped ids); the whole
    # input projection then becomes a single batched matmul inside the kernel.
    tok = jnp.clip(tokens.astype(jnp.int32), 0, V - 1)
    x = jnp.take(emb, tok, axis=0)                                   # (T, H)

    h0 = jnp.zeros((1, Hp), jnp.float32).at[:, :H].set(hidden.reshape(1, H))

    grid_spec = pltpu.PrefetchScalarGridSpec(
        num_scalar_prefetch=0,
        grid=(1,),                                  # whole time loop inside one grid step
        in_specs=[
            pl.BlockSpec((T, H), lambda i: (0, 0)),            # embedded tokens
            pl.BlockSpec((1, Hp), lambda i: (0, 0)),           # initial hidden
            pl.BlockSpec((H, 3 * Hp), lambda i: (0, 0)),       # W_ih fused
            pl.BlockSpec((Hp, 3 * Hp), lambda i: (0, 0)),      # W_hh fused
            pl.BlockSpec((1, 3 * Hp), lambda i: (0, 0)),       # b_ih
            pl.BlockSpec((1, 3 * Hp), lambda i: (0, 0)),       # b_hh
        ],
        out_specs=pl.BlockSpec((T, Hp), lambda i: (0, 0)),
        scratch_shapes=[
            pltpu.VMEM((T, 3 * Hp), jnp.float32),              # hoisted input projections
        ],
    )

    out_pad = pl.pallas_call(
        encoder_gru_kernel,
        out_shape=jax.ShapeDtypeStruct((T, Hp), jnp.float32),
        grid_spec=grid_spec,
        compiler_params=pltpu.CompilerParams(dimension_semantics=("arbitrary",)),
    )(x, h0, wih, whh, bih, bhh)

    out_seq = out_pad[:, :H].reshape(T, 1, H)
    final_hidden = out_seq[T - 1].reshape(1, 1, H)   # last output == final hidden state
    return out_seq, final_hidden


def encoder_forward(token, hidden, params):
    """Exact equivalent of Encoder.forward(input, hidden): one token, one GRU step.
    Returns (output, hidden), both (1, 1, H), like the PyTorch module."""
    tokens = jnp.asarray(token, dtype=jnp.int32).reshape((1,))
    out, hid = encoder_run(tokens, hidden, params)
    return out, hid


def init_params(key, input_size, hidden_size):
    """Synthetic parameters matching nn.Embedding(V, H) + nn.GRU(H, H) shapes.

    GRU weights are stored pre-transposed, gate-concatenated in torch order (r, z, n),
    and lane-padded: gate g lives in columns [g*Hp, g*Hp + H) of a (rows, 3*Hp) array,
    the rest is zero (so padding lanes stay exactly zero through the recurrence).
    Dense (un-padded) copies are kept for the pure-JAX reference."""
    H = hidden_size
    Hp = _round_up(H, 128)
    k_emb, k_wih, k_whh, k_bih, k_bhh = jax.random.split(key, 5)
    bound = 1.0 / (H ** 0.5)
    emb = jax.random.normal(k_emb, (input_size, H), jnp.float32)
    w_ih_d = jax.random.uniform(k_wih, (H, 3 * H), jnp.float32, -bound, bound)
    w_hh_d = jax.random.uniform(k_whh, (H, 3 * H), jnp.float32, -bound, bound)
    b_ih_d = jax.random.uniform(k_bih, (1, 3 * H), jnp.float32, -bound, bound)
    b_hh_d = jax.random.uniform(k_bhh, (1, 3 * H), jnp.float32, -bound, bound)

    def pad_gates(w, rows):
        out = jnp.zeros((rows, 3 * Hp), jnp.float32)
        for g in range(3):
            out = out.at[:w.shape[0], g * Hp:g * Hp + H].set(w[:, g * H:(g + 1) * H])
        return out

    return {
        "embedding": emb,
        "w_ih": pad_gates(w_ih_d, H),
        "w_hh": pad_gates(w_hh_d, Hp),
        "b_ih": pad_gates(b_ih_d, 1),
        "b_hh": pad_gates(b_hh_d, 1),
        "w_ih_dense": w_ih_d, "w_hh_dense": w_hh_d,
        "b_ih_dense": b_ih_d, "b_hh_dense": b_hh_d,
    }


def reference_step(x, h, params):
    """Pure-JAX single GRU step replicating torch.nn.GRU math (dense fused-gate layout)."""
    H = h.shape[-1]
    gi = x @ params["w_ih_dense"] + params["b_ih_dense"]
    gh = h @ params["w_hh_dense"] + params["b_hh_dense"]
    r = jax.nn.sigmoid(gi[:, 0:H] + gh[:, 0:H])
    z = jax.nn.sigmoid(gi[:, H:2 * H] + gh[:, H:2 * H])
    n = jnp.tanh(gi[:, 2 * H:3 * H] + r * gh[:, 2 * H:3 * H])
    return (1.0 - z) * n + z * h


if __name__ == "__main__":
    input_size = 16     # vocabulary size
    hidden_size = 32
    seq_len = 8

    key = jax.random.PRNGKey(0)
    params = init_params(key, input_size, hidden_size)
    hidden0 = jnp.zeros((1, 1, hidden_size), dtype=jnp.float32)   # Encoder.init_hidden()

    # --- single-step check: exact Encoder.forward semantics -------------------
    token = jnp.array([3], dtype=jnp.int32)
    output, new_hidden = encoder_forward(token, hidden0, params)
    jax.block_until_ready((output, new_hidden))

    x0 = params["embedding"][3].reshape(1, hidden_size)
    h_ref = reference_step(x0, hidden0.reshape(1, hidden_size), params)
    assert output.shape == (1, 1, hidden_size) and new_hidden.shape == (1, 1, hidden_size)
    assert jnp.allclose(output.reshape(1, hidden_size), h_ref, atol=1e-4, rtol=1e-4)
    assert jnp.allclose(new_hidden.reshape(1, hidden_size), h_ref, atol=1e-4, rtol=1e-4)

    # --- sequence check: T steps fused into one pallas_call / one grid step ---
    tokens = jax.random.randint(jax.random.PRNGKey(1), (seq_len,), 0, input_size, jnp.int32)
    out_seq, hid_seq = encoder_run(tokens, hidden0, params)
    jax.block_until_ready((out_seq, hid_seq))

    h = hidden0.reshape(1, hidden_size)
    ref_rows = []
    for t in range(seq_len):
        x_t = params["embedding"][tokens[t]].reshape(1, hidden_size)
        h = reference_step(x_t, h, params)
        ref_rows.append(h)
    ref_seq = jnp.stack(ref_rows).reshape(seq_len, 1, hidden_size)

    assert out_seq.shape == (seq_len, 1, hidden_size)
    assert jnp.allclose(out_seq, ref_seq, atol=1e-4, rtol=1e-4)
    assert jnp.allclose(hid_seq.reshape(1, hidden_size), h, atol=1e-4, rtol=1e-4)

    print("KERNEL_OK")
</pallas_src>

<mosaic_0001>
module attributes {stable_mosaic.version = 11 : i64} {
  func.func @encoder_gru_kernel(%arg0: i32, %arg1: memref<1x32xf32, #tpu.memory_space<vmem>>, %arg2: memref<1x128xf32, #tpu.memory_space<vmem>>, %arg3: memref<32x384xf32, #tpu.memory_space<vmem>>, %arg4: memref<128x384xf32, #tpu.memory_space<vmem>>, %arg5: memref<1x384xf32, #tpu.memory_space<vmem>>, %arg6: memref<1x384xf32, #tpu.memory_space<vmem>>, %arg7: memref<1x128xf32, #tpu.memory_space<vmem>>, %arg8: memref<1x384xf32, #tpu.memory_space<vmem>>) attributes {dimension_semantics = [#tpu.dimension_semantics<arbitrary>], iteration_bounds = array<i64: 1>, scalar_prefetch = 0 : i64, scratch_operands = 1 : i64, tpu.core_type = #tpu.core_type<tc>, window_params = [{pipeline_mode = #tpu.pipeline_mode<synchronous>, transform_indices = @transform_0, window_bounds = array<i64: 1, 32>}, {pipeline_mode = #tpu.pipeline_mode<synchronous>, transform_indices = @transform_1, window_bounds = array<i64: 1, 128>}, {pipeline_mode = #tpu.pipeline_mode<synchronous>, transform_indices = @transform_2, window_bounds = array<i64: 32, 384>}, {pipeline_mode = #tpu.pipeline_mode<synchronous>, transform_indices = @transform_3, window_bounds = array<i64: 128, 384>}, {pipeline_mode = #tpu.pipeline_mode<synchronous>, transform_indices = @transform_4, window_bounds = array<i64: 1, 384>}, {pipeline_mode = #tpu.pipeline_mode<synchronous>, transform_indices = @transform_5, window_bounds = array<i64: 1, 384>}, {pipeline_mode = #tpu.pipeline_mode<synchronous>, transform_indices = @transform_6, window_bounds = array<i64: 1, 128>}]} {
    %c0 = arith.constant 0 : index
    %c0_0 = arith.constant 0 : index
    %0 = vector.load %arg1[%c0, %c0_0] : memref<1x32xf32, #tpu.memory_space<vmem>>, vector<1x32xf32>
    %c0_1 = arith.constant 0 : index
    %c0_2 = arith.constant 0 : index
    %1 = vector.load %arg3[%c0_1, %c0_2] : memref<32x384xf32, #tpu.memory_space<vmem>>, vector<32x384xf32>
    %cst = arith.constant dense<0.000000e+00> : vector<1x384xf32>
    %2 = tpu.matmul %0, %1, %cst {dimension_numbers = #tpu.dot_dimension_numbers<[1], [0], [0], [1], [0, 0, 1, 1], [], []>} : vector<1x32xf32>, vector<32x384xf32>, vector<1x384xf32> -> vector<1x384xf32>
    %c0_3 = arith.constant 0 : index
    %c0_4 = arith.constant 0 : index
    %3 = vector.load %arg5[%c0_3, %c0_4] : memref<1x384xf32, #tpu.memory_space<vmem>>, vector<1x384xf32>
    %4 = arith.addf %2, %3 : vector<1x384xf32>
    %c0_5 = arith.constant 0 : index
    %c0_6 = arith.constant 0 : index
    %5 = vector.load %arg8[%c0_5, %c0_6] : memref<1x384xf32, #tpu.memory_space<vmem>>, vector<1x384xf32>
    tpu.vector_store %arg8[%c0_5, %c0_6], %4 {strides = array<i32>} : memref<1x384xf32, #tpu.memory_space<vmem>>, vector<1x384xf32>,
    %c0_7 = arith.constant 0 : index
    %c0_8 = arith.constant 0 : index
    %6 = vector.load %arg2[%c0_7, %c0_8] : memref<1x128xf32, #tpu.memory_space<vmem>>, vector<1x128xf32>
    %c0_i32 = arith.constant 0 : i32
    %c0_9 = arith.constant 0 : index
    %c0_10 = arith.constant 0 : index
    %7 = vector.load %arg4[%c0_9, %c0_10] : memref<128x384xf32, #tpu.memory_space<vmem>>, vector<128x384xf32>
    %cst_11 = arith.constant dense<0.000000e+00> : vector<1x384xf32>
    %8 = tpu.matmul %6, %7, %cst_11 {dimension_numbers = #tpu.dot_dimension_numbers<[1], [0], [0], [1], [0, 0, 1, 1], [], []>} : vector<1x128xf32>, vector<128x384xf32>, vector<1x384xf32> -> vector<1x384xf32>
    %c0_12 = arith.constant 0 : index
    %c0_13 = arith.constant 0 : index
    %9 = vector.load %arg6[%c0_12, %c0_13] : memref<1x384xf32, #tpu.memory_space<vmem>>, vector<1x384xf32>
    %10 = arith.addf %8, %9 : vector<1x384xf32>
    %11 = arith.index_cast %c0_i32 : i32 to index
    %c0_14 = arith.constant 0 : index
    %12 = vector.load %arg8[%11, %c0_14] : memref<1x384xf32, #tpu.memory_space<vmem>>, vector<1x384xf32>
    %13 = vector.extract_strided_slice %12 {offsets = [0, 0], sizes = [1, 128], strides = [1, 1]} : vector<1x384xf32> to vector<1x128xf32>
    %14 = vector.extract_strided_slice %10 {offsets = [0, 0], sizes = [1, 128], strides = [1, 1]} : vector<1x384xf32> to vector<1x128xf32>
    %15 = arith.addf %13, %14 : vector<1x128xf32>
    %16 = arith.negf %15 : vector<1x128xf32>
    %17 = math.exp %16 : vector<1x128xf32>
    %cst_15 = arith.constant 1.000000e+00 : f32
    %18 = vector.broadcast %cst_15 : f32 to vector<1x128xf32>
    %19 = arith.addf %18, %17 : vector<1x128xf32>
    %20 = arith.divf %18, %19 : vector<1x128xf32>
    %21 = vector.extract_strided_slice %12 {offsets = [0, 128], sizes = [1, 128], strides = [1, 1]} : vector<1x384xf32> to vector<1x128xf32>
    %22 = vector.extract_strided_slice %10 {offsets = [0, 128], sizes = [1, 128], strides = [1, 1]} : vector<1x384xf32> to vector<1x128xf32>
    %23 = arith.addf %21, %22 : vector<1x128xf32>
    %24 = arith.negf %23 : vector<1x128xf32>
    %25 = math.exp %24 : vector<1x128xf32>
    %cst_16 = arith.constant 1.000000e+00 : f32
    %26 = vector.broadcast %cst_16 : f32 to vector<1x128xf32>
    %27 = arith.addf %26, %25 : vector<1x128xf32>
    %28 = arith.divf %26, %27 : vector<1x128xf32>
    %29 = vector.extract_strided_slice %12 {offsets = [0, 256], sizes = [1, 128], strides = [1, 1]} : vector<1x384xf32> to vector<1x128xf32>
    %30 = vector.extract_strided_slice %10 {offsets = [0, 256], sizes = [1, 128], strides = [1, 1]} : vector<1x384xf32> to vector<1x128xf32>
    %31 = arith.mulf %20, %30 : vector<1x128xf32>
    %32 = arith.addf %29, %31 : vector<1x128xf32>
    %33 = math.tanh %32 : vector<1x128xf32>
    %cst_17 = arith.constant 1.000000e+00 : f32
    %34 = vector.broadcast %cst_17 : f32 to vector<1x128xf32>
    %35 = arith.subf %34, %28 : vector<1x128xf32>
    %36 = arith.mulf %35, %33 : vector<1x128xf32>
    %37 = arith.mulf %28, %6 : vector<1x128xf32>
    %38 = arith.addf %36, %37 : vector<1x128xf32>
    %39 = arith.index_cast %c0_i32 : i32 to index
    %c0_18 = arith.constant 0 : index
    %40 = vector.load %arg7[%39, %c0_18] : memref<1x128xf32, #tpu.memory_space<vmem>>, vector<1x128xf32>
    tpu.vector_store %arg7[%39, %c0_18], %38 {strides = array<i32>} : memref<1x128xf32, #tpu.memory_space<vmem>>, vector<1x128xf32>,
    %c1_i32 = arith.constant 1 : i32
    return
  }
  func.func @transform_0(%arg0: i32) -> (i32, i32) {
    %c0_i32 = arith.constant 0 : i32
    %c0_i32_0 = arith.constant 0 : i32
    %c0_i32_1 = arith.constant 0 : i32
    return %c0_i32, %c0_i32_0 : i32, i32
  }
  func.func @transform_1(%arg0: i32) -> (i32, i32) {
    %c0_i32 = arith.constant 0 : i32
    %c0_i32_0 = arith.constant 0 : i32
    %c0_i32_1 = arith.constant 0 : i32
    return %c0_i32, %c0_i32_0 : i32, i32
  }
  func.func @transform_2(%arg0: i32) -> (i32, i32) {
    %c0_i32 = arith.constant 0 : i32
    %c0_i32_0 = arith.constant 0 : i32
    %c0_i32_1 = arith.constant 0 : i32
    return %c0_i32, %c0_i32_0 : i32, i32
  }
  func.func @transform_3(%arg0: i32) -> (i32, i32) {
    %c0_i32 = arith.constant 0 : i32
    %c0_i32_0 = arith.constant 0 : i32
    %c0_i32_1 = arith.constant 0 : i32
    return %c0_i32, %c0_i32_0 : i32, i32
  }
  func.func @transform_4(%arg0: i32) -> (i32, i32) {
    %c0_i32 = arith.constant 0 : i32
    %c0_i32_0 = arith.constant 0 : i32
    %c0_i32_1 = arith.constant 0 : i32
    return %c0_i32, %c0_i32_0 : i32, i32
  }
  func.func @transform_5(%arg0: i32) -> (i32, i32) {
    %c0_i32 = arith.constant 0 : i32
    %c0_i32_0 = arith.constant 0 : i32
    %c0_i32_1 = arith.constant 0 : i32
    return %c0_i32, %c0_i32_0 : i32, i32
  }
  func.func @transform_6(%arg0: i32) -> (i32, i32) {
    %c0_i32 = arith.constant 0 : i32
    %c0_i32_0 = arith.constant 0 : i32
    %c0_i32_1 = arith.constant 0 : i32
    return %c0_i32, %c0_i32_0 : i32, i32
  }
}

</mosaic_0001>

<bundles_post_ra>
// kernel: tpu_custom_call.1
= control target key start
LH: loop header
LB: loop body
LE: loop exit
PB: predicated region body
PF: predicated region fallthrough
CT: control target
= control target key end

     0   :  { %11 = vsyncpa [#allocation4], 0  ;;  %s796_s0 = inlined_call_operand.hbm [shape: f32[1,32], index: 0, kind: input, shape index: {}]   ;;  %s797_s1 = inlined_call_operand.vmem [shape: f32[1,128], index: 1, kind: input, shape index: {}]   ;;  %s798_s2 = inlined_call_operand.hbm [shape: f32[32,384], index: 2, kind: input, shape index: {}]   ;;  %s799_s3 = inlined_call_operand.hbm [shape: f32[128,384], index: 3, kind: input, shape index: {}]   ;;  %s800_s4 = inlined_call_operand.vmem [shape: f32[1,384], index: 4, kind: input, shape index: {}]   ;;  %s801_s5 = inlined_call_operand.vmem [shape: f32[1,384], index: 5, kind: input, shape index: {}]   ;;  %s802_s6 = inlined_call_operand.hbm [shape: f32[1,128], index: 6, kind: output, shape index: {}]  }
   0x1   :  { %12 = vsyncpa [#allocation7], 0 }
   0x2   :  { %13 = vsyncpa [#allocation5], 0  ;;  %s698_s21 = smov [#allocation6]  }
   0x3   :  { %s31_s22 = sshll.u32 %s698_s21, 4  ;;  %s32_s22 = int_to_ptr.vmem [resolvable:$true] %s31_s22 }
   0x4   :  { %s620_s23 = scalar_lea.vmem %s32_s22, 1536  ;;  %p625_p1 = scmp.lt.s32.totalorder %s32_s22, %s32_s22 }
   0x5   :  { %p621_p0 = scmp.ne.s32.totalorder %s32_s22, %s620_s23  ;;  %p626_p2 = scmp.lt.s32.totalorder %s620_s23, %s620_s23 }
   0x7   :  { %p627_p3 = por %p626_p2, %p625_p1 }
   0x9   :  { %p628_p4 = pnand %p627_p3, %p621_p0 }
   0xb   :  { %631 = shalt.err (!%p628_p4)
}
   0xc   :  { %s699_s24 = smov 384   ;;  %s700_s25 = smov 24  }
   0xd   :  { %37 = dma.hbm_to_vmem [thread:$0]  %s798_s2, 1536, %s32_s22, [#allocation7], %s699_s24, %s699_s24, %s700_s25  }
   0xe   :  { %s701_s28 = smov [#allocation3]   ;;  %s702_s30 = smov [#allocation8]  }
   0xf   :  { %s20_s29 = sshll.u32 %s701_s28, 4  ;;  %s43_s7 = sshll.u32 %s702_s30, 4  ;;  %s21_s29 = int_to_ptr.vmem [resolvable:$true] %s20_s29  ;;  %s44_s7 = int_to_ptr.vmem [resolvable:$true] %s43_s7 }
  0x10   :  { %s640_s8 = scalar_lea.vmem %s21_s29, 16  ;;  %s644_s9 = scalar_lea.vmem %s21_s29, 32 }
  0x11   :  { %p641_p5 = scmp.ne.s32.totalorder %s21_s29, %s640_s8  ;;  %p645_p6 = scmp.lt.s32.totalorder %s21_s29, %s21_s29 }
  0x12   :  { %p646_p7 = scmp.lt.s32.totalorder %s644_s9, %s640_s8 }
  0x14   :  { %p647_p8 = por %p646_p7, %p645_p6 }
  0x16   :  { %p648_p9 = pnand %p647_p8, %p641_p5 }
  0x18   :  { %651 = shalt.err (!%p648_p9)
}
  0x19   :  { %23 = dma.hbm_to_vmem [thread:$0]  %s796_s0, 16, %s21_s29, [#allocation4]  }
  0x1a   :  { %s660_s12 = scalar_lea.vmem %s44_s7, 6144  ;;  %p665_p11 = scmp.lt.s32.totalorder %s44_s7, %s44_s7 }
  0x1b   :  { %p661_p10 = scmp.ne.s32.totalorder %s44_s7, %s660_s12  ;;  %p666_p12 = scmp.lt.s32.totalorder %s660_s12, %s660_s12 }
  0x1d   :  { %p667_p13 = por %p666_p12, %p665_p11 }
  0x1f   :  { %p668_p0 = pnand %p667_p13, %p661_p10 }
  0x21   :  { %671 = shalt.err (!%p668_p0)
}
  0x22   :  { %49 = dma.hbm_to_vmem [thread:$0]  %s799_s3, 6144, %s44_s7, [#allocation7], %s699_s24, %s699_s24, %s700_s25  }
  0x23   :  { %692 = dma.done.wait [#allocation4], 16  }
  0x24   :  { %693 = vsyncadd [#allocation4], 4294967280 }
  0x25   :  { %694 = dma.done.wait [#allocation7], 7680  }
  0x26   :  { %695 = vsyncadd [#allocation7], 4294959616  ;;  %v703_v0 = vmov 0.0   ;;  %vm704_vm0 = vmmov 0   ;;  %v74_v1 = vld [vmem:[#allocation6 + $0x50] sm:$0xff]  ;;  %v73_v2 = vld [vmem:[#allocation6 + $0x48] sm:$0xff]  ;;  %v78_v63 = vlaneseq }
  0x27   :  { %547 = vmatprep.subr.mxu1 %v703_v0  ;;  %161 = vmatprep.mubr.f32.mxu0 %v703_v0  ;;  %v71_v3 = vld [vmem:[#allocation6 + $0x38] sm:$0xff]  ;;  %v70_v4 = vld [vmem:[#allocation6 + $0x30] sm:$0xff]  ;;  %v68_v5 = vld [vmem:[#allocation6 + $0x20] sm:$0xff]  ;;  %vm93_vm1 = vcmask 261120  }
  0x28   :  { %555 = vmatprep.mubr.msk.f32.mxu1 %vm704_vm0, %v703_v0  ;;  %121 = vmatprep.subr.mxu0 %v74_v1  ;;  %v75_v6 = vld [vmem:[#allocation6 + $0x58] sm:$0xff]  ;;  %v72_v8 = vld [vmem:[#allocation6 + $0x40] sm:$0xff]  ;;  %v65_v9 = vld [vmem:[#allocation6 + $0x8] sm:$0xff]  ;;  %v79_v1 = vshrl.u32 %v78_v63, 7  ;;  %vm267_vm2 = vcmp.lt.s32.totalorder %v78_v63, 384 }
  0x29   :  { %122 = vmatpush1.msra.mxu0 %v73_v2  ;;  %v67_v7 = vld [vmem:[#allocation6 + $0x18] sm:$0xff]  ;;  %548 = vmatpush3.msra.mxu1 %v75_v6  ;;  %v69_v10 = vld [vmem:[#allocation6 + $0x28] sm:$0xff]  ;;  %v64_v11 = vld [vmem:[#allocation6] sm:$0xff] }
  0x2a   :  { %123 = vmatprep.subr.mxu0 %v71_v3  ;;  %549 = vmatprep.subr.mxu1 %v703_v0  ;;  %v63_v12 = vld [vmem:[#allocation3] sm:$0x1]  ;;  %v317_v13 = vld [vmem:[#allocation8 + $0x170] sm:$0xff]  ;;  %v316_v14 = vld [vmem:[#allocation8 + $0x168] sm:$0xff]  ;;  %v80_v2 = vsub.s32 0, %v79_v1  ;;  %v84_v6 = vsub.s32 1, %v79_v1 }
  0x2b   :  { %124 = vmatpush1.msra.mxu0 %v70_v4  ;;  %550 = vmatpush3.msra.mxu1 %v72_v8  ;;  %v66_v15 = vld [vmem:[#allocation6 + $0x10] sm:$0xff]  ;;  %v314_v16 = vld [vmem:[#allocation8 + $0x158] sm:$0xff]  ;;  %v311_v18 = vld [vmem:[#allocation8 + $0x140] sm:$0xff]  ;;  %v705_v3 = vmov 1966171168  }
  0x2c   :  { %125 = vmatprep.subr.mxu0 %v68_v5  ;;  %551 = vmatprep.subr.mxu1 %v703_v0  ;;  %v313_v17 = vld [vmem:[#allocation8 + $0x150] sm:$0xff]  ;;  %v310_v19 = vld [vmem:[#allocation8 + $0x138] sm:$0xff]  ;;  %v308_v20 = vld [vmem:[#allocation8 + $0x128] sm:$0xff]  ;;  %v243_v4 = vunpack.c.l.s4 %v705_v3 }
  0x2d   :  { %126 = vmatpush1.msra.mxu0 %v67_v7  ;;  %552 = vmatpush3.msra.mxu1 %v69_v10  ;;  %v307_v21 = vld [vmem:[#allocation8 + $0x120] sm:$0xff]  ;;  %v305_v22 = vld [vmem:[#allocation8 + $0x110] sm:$0xff]  ;;  %v304_v23 = vld [vmem:[#allocation8 + $0x108] sm:$0xff]  ;;  %v88_v7 = vsub.s32 2, %v79_v1 }
  0x2e   :  { %127 = vmatprep.subr.mxu0 %v65_v9  ;;  %553 = vmatprep.subr.mxu1 %v703_v0  ;;  %v318_v24 = vld [vmem:[#allocation8 + $0x178] sm:$0xff]  ;;  %v315_v25 = vld [vmem:[#allocation8 + $0x160] sm:$0xff]  ;;  %v301_v27 = vld [vmem:[#allocation8 + $0xf0] sm:$0xff]  ;;  %v244_v9 = vunpack.c.0.s8 %v243_v4 }
  0x2f   :  { %128 = vmatpush1.msra.mxu0 %v64_v11  ;;  %554 = vmatpush3.msra.mxu1 %v66_v15  ;;  %v302_v26 = vld [vmem:[#allocation8 + $0xf8] sm:$0xff]  ;;  %v312_v28 = vld [vmem:[#allocation8 + $0x148] sm:$0xff]  ;;  %v299_v29 = vld [vmem:[#allocation8 + $0xe0] sm:$0xff] }
  0x30   :  { %521 = vmatmul.mubr.msk.f32.vlgmr.msra.gmra.mxu0 %vm93_vm1, %v63_v12  ;;  %336 = vmatprep.subr.mxu0 %v317_v13  ;;  %v298_v30 = vld [vmem:[#allocation8 + $0xd8] sm:$0xff]  ;;  %v309_v31 = vld [vmem:[#allocation8 + $0x130] sm:$0xff]  ;;  %v296_v32 = vld [vmem:[#allocation8 + $0xc8] sm:$0xff]  ;;  %v247_v13 = vsub.s32 %v244_v9, %v79_v1 }
  0x31   :  { %337 = vmatpush1.msra.mxu0 %v316_v14  ;;  %556 = vmatmul.mubr.msk.f32.vlgmr.msra.gmra.mxu1 %vm93_vm1, %v63_v12  ;;  %v295_v33 = vld [vmem:[#allocation8 + $0xc0] sm:$0xff]  ;;  %v306_v34 = vld [vmem:[#allocation8 + $0x118] sm:$0xff]  ;;  %v293_v35 = vld [vmem:[#allocation8 + $0xb0] sm:$0xff] }
  0x32   :  { %338 = vmatprep.subr.mxu0 %v314_v16  ;;  %400 = vmatprep.mubr.f32.mxu0 %v703_v0  ;;  %v292_v36 = vld [vmem:[#allocation8 + $0xa8] sm:$0xff]  ;;  %v303_v37 = vld [vmem:[#allocation8 + $0x100] sm:$0xff]  ;;  %v290_v38 = vld [vmem:[#allocation8 + $0x98] sm:$0xff] }
  0x33   :  { %339 = vmatpush1.msra.mxu0 %v313_v17  ;;  %558 = vmatprep.subr.mxu1 %v703_v0  ;;  %v289_v39 = vld [vmem:[#allocation8 + $0x90] sm:$0xff]  ;;  %v300_v40 = vld [vmem:[#allocation8 + $0xe8] sm:$0xff]  ;;  %v287_v41 = vld [vmem:[#allocation8 + $0x80] sm:$0xff] }
  0x34   :  { %340 = vmatprep.subr.mxu0 %v311_v18  ;;  %590 = vmatprep.mubr.msk.f32.mxu1 %vm704_vm0, %v703_v0  ;;  %v286_v42 = vld [vmem:[#allocation8 + $0x78] sm:$0xff]  ;;  %v297_v43 = vld [vmem:[#allocation8 + $0xd0] sm:$0xff]  ;;  %v284_v44 = vld [vmem:[#allocation8 + $0x68] sm:$0xff] }
  0x35   :  { %341 = vmatpush1.msra.mxu0 %v310_v19  ;;  %559 = vmatpush3.msra.mxu1 %v318_v24  ;;  %v283_v45 = vld [vmem:[#allocation8 + $0x60] sm:$0xff]  ;;  %v294_v46 = vld [vmem:[#allocation8 + $0xb8] sm:$0xff]  ;;  %v281_v47 = vld [vmem:[#allocation8 + $0x50] sm:$0xff] }
  0x36   :  { %342 = vmatprep.subr.mxu0 %v308_v20  ;;  %560 = vmatprep.subr.mxu1 %v703_v0  ;;  %v280_v48 = vld [vmem:[#allocation8 + $0x48] sm:$0xff]  ;;  %v291_v49 = vld [vmem:[#allocation8 + $0xa0] sm:$0xff]  ;;  %v278_v50 = vld [vmem:[#allocation8 + $0x38] sm:$0xff] }
  0x37   :  { %343 = vmatpush1.msra.mxu0 %v307_v21  ;;  %561 = vmatpush3.msra.mxu1 %v315_v25  ;;  %v277_v51 = vld [vmem:[#allocation8 + $0x30] sm:$0xff]  ;;  %v288_v52 = vld [vmem:[#allocation8 + $0x88] sm:$0xff]  ;;  %v275_v53 = vld [vmem:[#allocation8 + $0x20] sm:$0xff] }
  0x38   :  { %344 = vmatprep.subr.mxu0 %v305_v22  ;;  %562 = vmatprep.subr.mxu1 %v703_v0  ;;  %v274_v54 = vld [vmem:[#allocation8 + $0x18] sm:$0xff]  ;;  %v285_v55 = vld [vmem:[#allocation8 + $0x70] sm:$0xff]  ;;  %v272_v56 = vld [vmem:[#allocation8 + $0x8] sm:$0xff] }
  0x39   :  { %345 = vmatpush1.msra.mxu0 %v304_v23  ;;  %563 = vmatpush3.msra.mxu1 %v312_v28  ;;  %v271_v57 = vld [vmem:[#allocation8] sm:$0xff]  ;;  %v282_v58 = vld [vmem:[#allocation8 + $0x58] sm:$0xff]  ;;  %v276_v61 = vld [vmem:[#allocation8 + $0x28] sm:$0xff] }
  0x3a   :  { %346 = vmatprep.subr.mxu0 %v302_v26  ;;  %564 = vmatprep.subr.mxu1 %v703_v0  ;;  %v778_v59 = vld [vmem:[%s797_s1] sm:$0x1]  ;;  %v279_v60 = vld [vmem:[#allocation8 + $0x40] sm:$0xff]  ;;  %v273_v62 = vld [vmem:[#allocation8 + $0x10] sm:$0xff] }
  0x3b   :  { %347 = vmatpush1.msra.mxu0 %v301_v27  ;;  %565 = vmatpush3.msra.mxu1 %v309_v31  ;;  %v76_v5 = vld [vmem:[%s800_s4] sm:$0x7] }
  0x3c   :  { %348 = vmatprep.subr.mxu0 %v299_v29  ;;  %566 = vmatprep.subr.mxu1 %v703_v0  ;;  %v81_v8 = vrot.slane %v76_v5, %v80_v2  ;;  %v85_v10 = vrot.slane %v76_v5, %v84_v6  ;;  %v89_v11 = vrot.slane %v76_v5, %v88_v7  ;;  %v319_v24 = vld [vmem:[%s801_s5] sm:$0x7]  ;;  %s706_s5 = smov [#allocation9]  }
  0x3d   :  { %349 = vmatpush1.msra.mxu0 %v298_v30  ;;  %567 = vmatpush3.msra.mxu1 %v306_v34  ;;  %v324_v25 = vrot.slane %v319_v24, %v80_v2  ;;  %v328_v28 = vrot.slane %v319_v24, %v84_v6  ;;  %s511_s16 = sshll.u32 %s706_s5, 4  ;;  %s512_s16 = int_to_ptr.vmem [resolvable:$true] %s511_s16 }
  0x3e   :  { %350 = vmatprep.subr.mxu0 %v296_v32  ;;  %568 = vmatprep.subr.mxu1 %v703_v0  ;;  %s672_s17 = scalar_lea.vmem %s512_s16, 16  ;;  %s676_s18 = scalar_lea.vmem %s512_s16, 32 }
  0x3f   :  { %351 = vmatpush1.msra.mxu0 %v295_v33  ;;  %569 = vmatpush3.msra.mxu1 %v303_v37  ;;  %p673_p1 = scmp.ne.s32.totalorder %s512_s16, %s672_s17  ;;  %p677_p2 = scmp.lt.s32.totalorder %s512_s16, %s512_s16 }
  0x40   :  { %352 = vmatprep.subr.mxu0 %v293_v35  ;;  %570 = vmatprep.subr.mxu1 %v703_v0  ;;  %p678_p3 = scmp.lt.s32.totalorder %s676_s18, %s672_s17 }
  0x41   :  { %353 = vmatpush1.msra.mxu0 %v292_v36  ;;  %571 = vmatpush3.msra.mxu1 %v300_v40 }
  0x42   :  { %354 = vmatprep.subr.mxu0 %v290_v38  ;;  %572 = vmatprep.subr.mxu1 %v703_v0  ;;  %p679_p4 = por %p678_p3, %p677_p2 }
  0x43   :  { %355 = vmatpush1.msra.mxu0 %v289_v39  ;;  %573 = vmatpush3.msra.mxu1 %v297_v43 }
  0x44   :  { %356 = vmatprep.subr.mxu0 %v287_v41  ;;  %574 = vmatprep.subr.mxu1 %v703_v0  ;;  %v332_v41 = vrot.slane %v319_v24, %v88_v7  ;;  %p680_p5 = pnand %p679_p4, %p673_p1 }
  0x45   :  { %357 = vmatpush1.msra.mxu0 %v286_v42  ;;  %575 = vmatpush3.msra.mxu1 %v294_v46 }
  0x46   :  { %358 = vmatprep.subr.mxu0 %v284_v44  ;;  %576 = vmatprep.subr.mxu1 %v703_v0 }
  0x47   :  { %359 = vmatpush1.msra.mxu0 %v283_v45  ;;  %577 = vmatpush3.msra.mxu1 %v291_v49 }
  0x48   :  { %360 = vmatprep.subr.mxu0 %v281_v47  ;;  %578 = vmatprep.subr.mxu1 %v703_v0 }
  0x49   :  { %361 = vmatpush1.msra.mxu0 %v280_v48  ;;  %579 = vmatpush3.msra.mxu1 %v288_v52 }
  0x4a   :  { %362 = vmatprep.subr.mxu0 %v278_v50  ;;  %580 = vmatprep.subr.mxu1 %v703_v0 }
  0x4b   :  { %363 = vmatpush1.msra.mxu0 %v277_v51  ;;  %581 = vmatpush3.msra.mxu1 %v285_v55 }
  0x4c   :  { %364 = vmatprep.subr.mxu0 %v275_v53  ;;  %582 = vmatprep.subr.mxu1 %v703_v0 }
  0x4d   :  { %365 = vmatpush1.msra.mxu0 %v274_v54  ;;  %583 = vmatpush3.msra.mxu1 %v282_v58 }
  0x4e   :  { %366 = vmatprep.subr.mxu0 %v272_v56  ;;  %584 = vmatprep.subr.mxu1 %v703_v0 }
  0x4f   :  { %367 = vmatpush1.msra.mxu0 %v271_v57  ;;  %585 = vmatpush3.msra.mxu1 %v279_v60 }
  0x50   :  { %401 = vmatmul.mubr.f32.vlgmr.msra.gmra.mxu0 %v778_v59  ;;  %586 = vmatprep.subr.mxu1 %v703_v0 }
  0x51   :  { %587 = vmatpush3.msra.mxu1 %v276_v61 }
  0x52   :  { %588 = vmatprep.subr.mxu1 %v703_v0 }
  0x53   :  { %589 = vmatpush3.msra.mxu1 %v273_v62 }
  0x54   :  { %591 = vmatmul.mubr.f32.vlgmr.msra.gmra.mxu1 %v778_v59 }
  0xf0   :  { %v163_v12 = vpop.f32.mrf.mxu0 }
  0xf1   :  { %v164_v0 = vadd.f32 %v163_v12, %v81_v8  ;;  %v234_v15 = vpop.f32.mrf.mxu1 }
  0xf2   :  { %v165_v14 = vpop.f32.mrf.mxu0  ;;  %v235_v17 = vadd.f32 %v234_v15, %v89_v11 }
  0xf3   :  { %v166_v16 = vadd.f32 %v165_v14, %v85_v10  ;;  %v557_v18 = vpop.f32.mrf.mxu1 }
  0xf4   :  { %v255_v20 = vrot.slane %v235_v17, %v247_v13 }
  0xf5   :  { %v241_v19 = vcombine.low %v164_v0, %v166_v16 }
  0xf7   :  { %v248_v21 = vrot.slane %v241_v19, %v247_v13 }
  0xf9   :  { %v256_v22 = vcombine.low %v248_v21, %v255_v20 }
  0xfb   :  { %v263_v23 = vrot.slane %v256_v22, %v247_v13 }
  0xfd   :  { %269 = vst.msk [vmem:[#allocation2] sm:$0x7] %vm267_vm2, %v263_v23 }
 0x104   :  { %v477_v29 = vld [vmem:[#allocation2] sm:$0x7] }
 0x105   :  { %v486_v35 = vrot.slane %v477_v29, 1  ;;  %v496_v47 = vrot.slane %v477_v29, 2 }
 0x110   :  { %v402_v26 = vpop.f32.mrf.mxu0 }
 0x111   :  { %v403_v27 = vadd.f32 %v402_v26, %v324_v25 }
 0x112   :  { %v404_v30 = vpop.f32.mrf.mxu0 }
 0x113   :  { %v478_v31 = vadd.f32 %v477_v29, %v403_v27  ;;  %v405_v33 = vadd.f32 %v404_v30, %v328_v28 }
 0x114   :  { %v473_v34 = vpop.f32.mrf.mxu1 }
 0x115   :  { %v523_v32 = vmul.f32 -1.442695, %v478_v31  ;;  %v488_v37 = vadd.f32 %v486_v35, %v405_v33  ;;  %v474_v44 = vadd.f32 %v473_v34, %v332_v41 }
 0x116   :  { %v592_v36 = vpop.f32.mrf.mxu1 }
 0x117   :  { %602 = vpow2.f32 %v523_v32  ;;  %v524_v38 = vmul.f32 -1.442695, %v488_v37 }
 0x119   :  { %604 = vpow2.f32 %v524_v38 }
 0x124   :  { %v603_v39 = vpop.eup %602 }
 0x125   :  { %v482_v40 = vadd.f32 1.0, %v603_v39 }
 0x126   :  { %v605_v42 = vpop.eup %604 }
 0x127   :  { %606 = vrcp.f32 %v482_v40  ;;  %v492_v43 = vadd.f32 1.0, %v605_v42 }
 0x129   :  { %608 = vrcp.f32 %v492_v43 }
 0x134   :  { %v607_v45 = vpop.eup %606 }
 0x135   :  { %v495_v46 = vmul.f32 %v607_v45, %v474_v44 }
 0x136   :  { %v609_v49 = vpop.eup %608 }
 0x137   :  { %v498_v48 = vadd.f32 %v496_v47, %v495_v46  ;;  %v500_v50 = vsub.f32 1.0, %v609_v49  ;;  %v502_v53 = vmul.f32 %v609_v49, %v778_v59 }
 0x139   :  { %610 = vtanh.f32 %v498_v48 }
 0x146   :  { %v611_v51 = vpop.eup %610 }
 0x147   :  { %v501_v52 = vmul.f32 %v611_v51, %v500_v50 }
 0x149   :  { %v503_v54 = vadd.f32 %v502_v53, %v501_v52 }
 0x14b   :  { %504 = vst [vmem:[#allocation9] sm:$0x1] %v503_v54 }
 0x14c   :  { %683 = shalt.err (!%p680_p5)
}
 0x14d   :  { %514 = dma.vmem_to_hbm [thread:$0]  %s512_s16, 16, %s802_s6, [#allocation5]  }
 0x14e   :  { %696 = dma.done.wait [#allocation5], 16  }
 0x14f   :  { %697 = vsyncadd [#allocation5], 4294967280 }
 0x150   :  { %518 = vsyncpa [#allocation4], 1 }
 0x151   :  { %519 = vsyncpa [#allocation7], 1 }
 0x152   :  { %520 = vsyncpa [#allocation5], 1 }

</bundles_post_ra>
